<compile_context>
chip_gen: v6e
topology: v6e:2x2x1
jax: 0.10.0
libtpu: 0.0.40
codegen_flags: <defaults>
</compile_context>

<pallas_src>
import math
import functools

import jax
import jax.numpy as jnp
from jax.experimental import pallas as pl
from jax.experimental.pallas import tpu as pltpu


def _arcface_kernel(emb_ref, ker_ref, lab_ref, out_ref, *,
                    tn, cos_m, sin_m, theta, mm, scale):
    j = pl.program_id(1)

    w = ker_ref[...]                                      # (E, tn) f32 or bf16 stream

    # Column L2 norm folded into a post-matmul scale: sum-of-squares + rsqrt
    # stay in f32 (rsqrt uses the otherwise-idle EUP slot). This replaces the
    # naive (E, tn) per-element divide of `w / ||w||` with a (B, tn) multiply
    # and avoids materializing a second (E, tn) tile of vregs.
    sumsq = jnp.sum(jnp.square(w.astype(jnp.float32)), axis=0, keepdims=True)
    inv_norm = jax.lax.rsqrt(sumsq)                       # (1, tn) f32

    # embeddings @ kernel on the MXU (f32 accumulation), normalize, then clip.
    raw = jnp.dot(emb_ref[...], w, preferred_element_type=jnp.float32)
    cos_t = jnp.clip(raw * inv_norm, -1.0, 1.0)           # clip AFTER the scale

    # ArcFace margin — all f32 elementwise (no bf16 VPU path on v5e).
    sin_t = jnp.sqrt(1.0 - cos_t * cos_t)
    phi = cos_t * cos_m - sin_t * sin_m
    phi = jnp.where((cos_t - theta) <= 0.0, cos_t - mm, phi)

    # logits = cos_theta everywhere, except phi at (i, label[i]).
    col_ids = jax.lax.broadcasted_iota(jnp.int32, cos_t.shape, 1) + j * tn
    label_mask = col_ids == lab_ref[...]                  # (bm, 1) broadcasts over tn
    out_ref[...] = (jnp.where(label_mask, phi, cos_t) * scale).astype(out_ref.dtype)


def _pick_tn(C, E, w_bytes, weight_budget_bytes=24 << 20):
    """Largest class tile that divides C, leaves >=2 tiles (v7x has 2 TCs) and
    keeps the double-buffered weight tile inside a v7x-safe VMEM budget."""
    candidates = (2048, 1024, 512, 256, 128)
    for tn in candidates:
        if C % tn == 0 and C // tn >= 2 and 2 * E * tn * w_bytes <= weight_budget_bytes:
            return tn
    for tn in candidates:  # C will be padded up to a multiple of tn
        if tn <= C and 2 * E * tn * w_bytes <= weight_budget_bytes:
            return tn
    return C  # tiny class count: single full-width tile


def _pick_bm(B):
    """Batch tile: single resident block for moderate B, else tile it."""
    if B <= 1024:
        return B
    for bm in (512, 256, 128, 64, 32, 16, 8):
        if B % bm == 0:
            return bm
    return B


def arc_margin_product(embeddings, kernel, label, *,
                       scale_factor=30.0, margin=0.5,
                       tn=None, bm=None, matmul_dtype=None):
    """Pallas TPU forward of ArcMarginProduct.

    embeddings:   (B, E) float32
    kernel:       (E, C) float32 (un-normalized parameter)
    label:        (B,)   int32 class ids
    matmul_dtype: optionally stream embeddings/kernel as jnp.bfloat16
                  (halves HBM traffic; margin math stays f32).
    returns:      (B, C) float32 logits
    """
    B, E = embeddings.shape
    E2, C = kernel.shape
    assert E == E2, "embedding dims must match"

    if matmul_dtype is not None:
        embeddings = embeddings.astype(matmul_dtype)
        kernel = kernel.astype(matmul_dtype)

    w_bytes = jnp.dtype(kernel.dtype).itemsize
    e_bytes = jnp.dtype(embeddings.dtype).itemsize

    if tn is None:
        tn = _pick_tn(C, E, w_bytes)
    if bm is None:
        bm = _pick_bm(B)
    assert B % bm == 0

    # Pad the class dim so tn divides it; padded columns are 1.0 so their
    # column norm is nonzero (padded logits are sliced off below).
    Cp = ((C + tn - 1) // tn) * tn
    if Cp != C:
        kernel = jnp.pad(kernel, ((0, 0), (0, Cp - C)), constant_values=1.0)

    cos_m = math.cos(margin)
    sin_m = math.sin(margin)
    theta = math.cos(math.pi - margin)
    mm = sin_m * margin

    label2d = label.astype(jnp.int32).reshape(B, 1)

    kern = functools.partial(
        _arcface_kernel, tn=tn,
        cos_m=cos_m, sin_m=sin_m, theta=theta, mm=mm, scale=scale_factor)

    # Explicit VMEM budget: double-buffered weight + output tiles, resident
    # embeddings/labels, plus slack — kept well under v7x's 64 MiB.
    vmem_limit = int(2 * bm * E * e_bytes + 2 * E * tn * w_bytes
                     + 2 * bm * tn * 4 + 2 * bm * 4) + (4 << 20)
    vmem_limit = min(max(vmem_limit, 16 << 20), 64 << 20)

    # TODO(synk): sweep pipeline_mode=pl.Buffered(3) on the weight BlockSpec if
    # xprof shows exposed DMA at large tn on real workloads.
    out = pl.pallas_call(
        kern,
        out_shape=jax.ShapeDtypeStruct((B, Cp), jnp.float32),
        grid_spec=pltpu.PrefetchScalarGridSpec(
            num_scalar_prefetch=0,
            grid=(B // bm, Cp // tn),
            in_specs=[
                pl.BlockSpec((bm, E), lambda i, j: (i, 0)),    # embeddings tile
                pl.BlockSpec((E, tn), lambda i, j: (0, j)),    # kernel class tile
                pl.BlockSpec((bm, 1), lambda i, j: (i, 0)),    # labels tile
            ],
            out_specs=pl.BlockSpec((bm, tn), lambda i, j: (i, j)),
        ),
        compiler_params=pltpu.CompilerParams(
            dimension_semantics=("parallel", "parallel"),
            vmem_limit_bytes=vmem_limit),
    )(embeddings, kernel, label2d)

    if Cp != C:
        out = out[:, :C]
    return out


def arc_margin_product_ref(embeddings, kernel, label, *,
                           scale_factor=30.0, margin=0.5):
    """Plain-JAX reference mirroring the PyTorch forward."""
    cos_m = math.cos(margin)
    sin_m = math.sin(margin)
    theta = math.cos(math.pi - margin)
    mm = sin_m * margin

    kn = kernel / jnp.linalg.norm(kernel, axis=0, keepdims=True)
    cos_t = jnp.clip(embeddings @ kn, -1.0, 1.0)
    sin_t = jnp.sqrt(1.0 - cos_t ** 2)
    phi = cos_t * cos_m - sin_t * sin_m
    phi = jnp.where((cos_t - theta) <= 0.0, cos_t - mm, phi)
    B = embeddings.shape[0]
    logits = cos_t.at[jnp.arange(B), label].set(phi[jnp.arange(B), label])
    return logits * scale_factor


if __name__ == "__main__":
    B, E, C = 8, 64, 1024          # batch, num_embeddings, num_classes (small test)
    key = jax.random.PRNGKey(0)
    k_emb, k_ker, k_lab = jax.random.split(key, 3)

    embeddings = jax.random.normal(k_emb, (B, E), dtype=jnp.float32)

    # Parameter init mimicking uniform_(-1,1).renorm_(2,1,1e-5).mul_(1e5):
    # each class column ends up with unit L2 norm.
    w = jax.random.uniform(k_ker, (E, C), minval=-1.0, maxval=1.0, dtype=jnp.float32)
    col_norm = jnp.linalg.norm(w, axis=0, keepdims=True)
    renorm_scale = jnp.where(col_norm > 1e-5, 1e-5 / col_norm, 1.0)
    kernel = w * renorm_scale * 1e5

    label = jax.random.randint(k_lab, (B,), 0, C, dtype=jnp.int32)

    # f32 path: bit-level semantics of the original module.
    out = arc_margin_product(embeddings, kernel, label)
    out = jax.block_until_ready(out)

    ref = arc_margin_product_ref(embeddings, kernel, label)
    assert out.shape == (B, C) and out.dtype == jnp.float32
    assert jnp.allclose(out, ref, atol=2e-3, rtol=2e-3), "mismatch vs reference"

    # bf16 streaming path (halves the HBM weight/activation stream; margin
    # math stays f32). Checked for shape/finiteness — bf16 changes rounding.
    out_bf16 = arc_margin_product(embeddings, kernel, label,
                                  matmul_dtype=jnp.bfloat16)
    out_bf16 = jax.block_until_ready(out_bf16)
    assert out_bf16.shape == (B, C) and out_bf16.dtype == jnp.float32
    assert bool(jnp.all(jnp.isfinite(out_bf16)))

    print("KERNEL_OK")
</pallas_src>

<mosaic_0001>
module attributes {stable_mosaic.version = 11 : i64} {
  func.func @_arcface_kernel(%arg0: i32, %arg1: i32, %arg2: memref<8x64xf32, #tpu.memory_space<vmem>>, %arg3: memref<64x512xf32, #tpu.memory_space<vmem>>, %arg4: memref<8x1xi32, #tpu.memory_space<vmem>>, %arg5: memref<8x512xf32, #tpu.memory_space<vmem>>) attributes {dimension_semantics = [#tpu.dimension_semantics<parallel>, #tpu.dimension_semantics<parallel>], iteration_bounds = array<i64: 1, 2>, scalar_prefetch = 0 : i64, scratch_operands = 0 : i64, tpu.core_type = #tpu.core_type<tc>, window_params = [{transform_indices = @transform_0, window_bounds = array<i64: 8, 64>}, {transform_indices = @transform_1, window_bounds = array<i64: 64, 512>}, {transform_indices = @transform_2, window_bounds = array<i64: 8, 1>}, {transform_indices = @transform_3, window_bounds = array<i64: 8, 512>}]} {
    %c0 = arith.constant 0 : index
    %c0_0 = arith.constant 0 : index
    %0 = vector.load %arg3[%c0, %c0_0] : memref<64x512xf32, #tpu.memory_space<vmem>>, vector<64x512xf32>
    %1 = arith.mulf %0, %0 : vector<64x512xf32>
    %cst = arith.constant dense<0.000000e+00> : vector<512xf32>
    %2 = vector.multi_reduction <add>, %1, %cst [0] : vector<64x512xf32> to vector<512xf32>
    %3 = vector.shape_cast %2 : vector<512xf32> to vector<1x512xf32>
    %4 = math.rsqrt %3 : vector<1x512xf32>
    %c0_1 = arith.constant 0 : index
    %c0_2 = arith.constant 0 : index
    %5 = vector.load %arg2[%c0_1, %c0_2] : memref<8x64xf32, #tpu.memory_space<vmem>>, vector<8x64xf32>
    %cst_3 = arith.constant dense<0.000000e+00> : vector<8x512xf32>
    %6 = tpu.matmul %5, %0, %cst_3 {dimension_numbers = #tpu.dot_dimension_numbers<[1], [0], [0], [1], [0, 0, 1, 1], [], []>} : vector<8x64xf32>, vector<64x512xf32>, vector<8x512xf32> -> vector<8x512xf32>
    %7 = vector.broadcast %4 : vector<1x512xf32> to vector<8x512xf32>
    %8 = arith.mulf %6, %7 : vector<8x512xf32>
    %cst_4 = arith.constant -1.000000e+00 : f32
    %cst_5 = arith.constant 1.000000e+00 : f32
    %9 = vector.broadcast %cst_4 : f32 to vector<8x512xf32>
    %10 = arith.maximumf %9, %8 : vector<8x512xf32>
    %11 = vector.broadcast %cst_5 : f32 to vector<8x512xf32>
    %12 = arith.minimumf %11, %10 : vector<8x512xf32>
    %13 = arith.mulf %12, %12 : vector<8x512xf32>
    %cst_6 = arith.constant 1.000000e+00 : f32
    %14 = vector.broadcast %cst_6 : f32 to vector<8x512xf32>
    %15 = arith.subf %14, %13 : vector<8x512xf32>
    %16 = math.sqrt %15 : vector<8x512xf32>
    %cst_7 = arith.constant 0.87758255 : f32
    %17 = vector.broadcast %cst_7 : f32 to vector<8x512xf32>
    %18 = arith.mulf %12, %17 : vector<8x512xf32>
    %cst_8 = arith.constant 0.47942555 : f32
    %19 = vector.broadcast %cst_8 : f32 to vector<8x512xf32>
    %20 = arith.mulf %16, %19 : vector<8x512xf32>
    %21 = arith.subf %18, %20 : vector<8x512xf32>
    %cst_9 = arith.constant -0.87758255 : f32
    %22 = vector.broadcast %cst_9 : f32 to vector<8x512xf32>
    %23 = arith.subf %12, %22 : vector<8x512xf32>
    %cst_10 = arith.constant 0.000000e+00 : f32
    %24 = vector.broadcast %cst_10 : f32 to vector<8x512xf32>
    %25 = arith.cmpf ole, %23, %24 : vector<8x512xf32>
    %cst_11 = arith.constant 0.239712775 : f32
    %26 = vector.broadcast %cst_11 : f32 to vector<8x512xf32>
    %27 = arith.subf %12, %26 : vector<8x512xf32>
    %28 = arith.select %25, %27, %21 : vector<8x512xi1>, vector<8x512xf32>
    %29 = tpu.iota {dimensions = array<i32: 1>} : vector<8x512xi32>
    %c512_i32 = arith.constant 512 : i32
    %30 = arith.muli %arg1, %c512_i32 : i32
    %31 = vector.broadcast %30 : i32 to vector<8x512xi32>
    %32 = arith.addi %29, %31 : vector<8x512xi32>
    %c0_12 = arith.constant 0 : index
    %c0_13 = arith.constant 0 : index
    %33 = vector.load %arg4[%c0_12, %c0_13] : memref<8x1xi32, #tpu.memory_space<vmem>>, vector<8x1xi32>
    %34 = vector.broadcast %33 : vector<8x1xi32> to vector<8x512xi32>
    %35 = arith.cmpi eq, %32, %34 : vector<8x512xi32>
    %36 = arith.select %35, %28, %12 : vector<8x512xi1>, vector<8x512xf32>
    %cst_14 = arith.constant 3.000000e+01 : f32
    %37 = vector.broadcast %cst_14 : f32 to vector<8x512xf32>
    %38 = arith.mulf %36, %37 : vector<8x512xf32>
    %c0_15 = arith.constant 0 : index
    %c0_16 = arith.constant 0 : index
    %39 = vector.load %arg5[%c0_15, %c0_16] : memref<8x512xf32, #tpu.memory_space<vmem>>, vector<8x512xf32>
    tpu.vector_store %arg5[%c0_15, %c0_16], %38 {strides = array<i32>} : memref<8x512xf32, #tpu.memory_space<vmem>>, vector<8x512xf32>,
    return
  }
  func.func @transform_0(%arg0: i32, %arg1: i32) -> (i32, i32) {
    %c0_i32 = arith.constant 0 : i32
    %c0_i32_0 = arith.constant 0 : i32
    return %arg0, %c0_i32 : i32, i32
  }
  func.func @transform_1(%arg0: i32, %arg1: i32) -> (i32, i32) {
    %c0_i32 = arith.constant 0 : i32
    %c0_i32_0 = arith.constant 0 : i32
    return %c0_i32, %arg1 : i32, i32
  }
  func.func @transform_2(%arg0: i32, %arg1: i32) -> (i32, i32) {
    %c0_i32 = arith.constant 0 : i32
    %c0_i32_0 = arith.constant 0 : i32
    return %arg0, %c0_i32 : i32, i32
  }
  func.func @transform_3(%arg0: i32, %arg1: i32) -> (i32, i32) {
    %c0_i32 = arith.constant 0 : i32
    return %arg0, %arg1 : i32, i32
  }
}

</mosaic_0001>

<bundles_post_ra>
// kernel: tpu_custom_call.1
= control target key start
LH: loop header
LB: loop body
LE: loop exit
PB: predicated region body
PF: predicated region fallthrough
CT: control target
= control target key end

     0   :  { %8 = vsyncpa [#allocation3], 0  ;;  %s1308_s0 = inlined_call_operand.vmem [shape: f32[8,64], index: 0, kind: input, shape index: {}]   ;;  %s1309_s1 = inlined_call_operand.hbm [shape: f32[64,1024], index: 1, kind: input, shape index: {}]   ;;  %s1310_s2 = inlined_call_operand.vmem [shape: s32[8,1], index: 2, kind: input, shape index: {}]   ;;  %s1311_s3 = inlined_call_operand.hbm [shape: f32[8,1024], index: 3, kind: output, shape index: {}]  }
   0x1   :  { %10 = vsyncpa [#allocation3 + $0x1], 0 }
   0x2   :  { %11 = vsyncpa [#allocation4], 0 }
   0x3   :  { %13 = vsyncpa [#allocation4 + $0x1], 0  ;;  %s996_s12 = smov 0   ;;  %s998_s13 = smov 0  }
   0x4   :  { %s1000_s14 = smov 0   ;;  %s1002_s15 = smov 0  }
   0x5   :  { %s1004_s16 = smov 0   ;;  %s1006_s17 = smov 0  }
   0x6 LB: > { %s741_s18 = sadd.s32 4294967295, %s967_s17   ;;  %s742_s19 = sadd.s32 4294967294, %s967_s17   ;;  %s967_s17 = sphi %s1006_s17, %s19_s17   ;;  %s963_s16 = sphi %s1004_s16, %s1322_s16   ;;  %s959_s15 = sphi %s1002_s15, %s1321_s15   ;;  %s955_s14 = sphi %s1000_s14, %s1320_s14   ;;  %s951_s13 = sphi %s998_s13, %s1319_s13   ;;  %s947_s12 = sphi %s996_s12, %s1318_s12  }
   0x7   : > { %s28_s20 = sadd.s32 1, %s963_s16  ;;  %s64_s21 = sadd.s32 1, %s955_s14 }
   0x8   : > { %p29_p0 = scmp.ge.s32.totalorder %s28_s20, 2  ;;  %p71_p1 = scmp.ne.s32.totalorder %s955_s14, %s951_s13 }
   0x9   : > { %p72_p2 = scmp.eq.s32.totalorder %s967_s17, 0  ;;  %p77_p3 = scmp.ne.s32.totalorder %s951_s13, %s947_s12 }
   0xa   : > { %s1324_s20 = smov (%p29_p0, %s28_s20), 0  ;;  %p78_p5 = scmp.eq.s32.totalorder %s741_s18, 0 }
   0xb   : > { %p1037_p4 = por %p72_p2, %p71_p1  ;;  %s61_s23 = ssub.s32 %s963_s16, %s1324_s20 }
   0xc   : > { %p129_p6 = scmp.eq.s32.totalorder %s741_s18, 1  ;;  %p62_p7 = scmp.eq.s32.totalorder %s61_s23, 0 }
   0xd   : > { %p1043_p8 = por %p78_p5, %p77_p3  ;;  %p135_p10 = scmp.eq.s32.totalorder %s742_s19, 1 }
   0xe   : > { %p1047_p9 = por %p129_p6, %p71_p1  ;;  %p787_p13 = scmp.lt.s32.totalorder %s967_s17, 2 }
   0xf   : > { %s1052_s26 = scalar_select %p62_p7, %s955_s14, %s64_s21  }
  0x10   : > { %p1054_p11 = por %p135_p10, %p77_p3  ;;  %s169_s28 = sand.u32 1, %s955_s14  }
  0x11   : > { %s747_s29 = sshll.u32 %s169_s28, 8  ;;  %s773_s30 = sshll.u32 %s963_s16, 9 }
  0x12   : > { %s179_s6 = scalar_lea.hbm %s1309_s1, %s773_s30  ;;  %s173_s7 = scalar_lea.vmem [#allocation2], %s747_s29 }
  0x13   : > { %s180_s8 = sshll.u32 %s173_s7, 4  ;;  %p1067_p0 = pnand %p787_p13, %p1037_p4  ;;  %s181_s8 = int_to_ptr.vmem [resolvable:$true] %s180_s8 }
  0x14   : > { %s170_s10 = scalar_lea.sflag [#allocation3], %s169_s28  ;;  %s872_s11 = scalar_lea.vmem %s181_s8, 4096 }
  0x15   : > { %p861_p1 = pneg %p1067_p0  ;;  %p873_p2 = scmp.ne.s32.totalorder %s181_s8, %s872_s11 }
  0x16   : > { %s969_s18 = smov [#allocation2]  }
  0x17   : > { %p875_p3 = pnand %p873_p2, %p861_p1  ;;  %s877_s19 = sshll.u32 %s969_s18, 4  ;;  %s878_s19 = int_to_ptr.vmem [resolvable:$false] %s877_s19 }
  0x18   : > { %s879_s21 = scalar_lea.vmem %s878_s19, 8192  ;;  %p880_p6 = scmp.lt.s32.totalorder %s181_s8, %s878_s19 }
  0x19   : > { %p876_p5 = pneg %p875_p3  ;;  %p881_p7 = scmp.lt.s32.totalorder %s879_s21, %s872_s11 }
  0x1b   : > { %p882_p10 = por %p881_p7, %p880_p6 }
  0x1d   : > { %p883_p12 = pnand %p882_p10, %p876_p5 }
  0x1f   : > { %886 = shalt.err (!%p883_p12)
}
  0x20   : > { %s970_s22 = smov 1024   ;;  %s971_s23 = smov 512  }
  0x21   : > { %s972_s28 = smov 32   ;;  %p750_p4 = scmp.ge.s32.totalorder %s967_s17, 1 }
  0x22   : > { %782 = dma.hbm_to_vmem [thread:$0]  (!%p1067_p0), %s179_s6, 4096, %s181_s8, %s170_s10, %s970_s22, %s971_s23, %s972_s28  }
  0x23   : > { %p188_p13 = scmp.lt.s32.totalorder %s967_s17, 3 }
  0x25   : > { %p189_p1 = pnand %p750_p4, %p188_p13 }
  0x26   : > { %s1078_s29 = sand.u32 (!%p189_p1), 1, %s951_s13  }
  0x27   : > { %192 = sbr.rel (%p189_p1) target bundleno = 306 (0x132), region = 32  ;;  %s751_s30 = sshll.u32 (!%p189_p1), %s1078_s29, 8 }
  0x28   : > { %s195_s4 = scalar_lea.sflag (!%p189_p1), [#allocation3], %s1078_s29  ;;  %s1082_s5 = scalar_lea.vmem (!%p189_p1), [#allocation2], %s751_s30 }
  0x2c   : > { %938 = dma.done.wait (%p1043_p8), %s195_s4, 4096  }
  0x2d   : > { %940 = vsyncadd (%p1043_p8), %s195_s4, 4294963200  ;;  %v973_v0 = vmov 0.0   ;;  %v974_v1 = vmov 0   ;;  %v1089_v2 = vld [vmem:[%s1082_s5 + $0xe8] sm:$0xff]  ;;  %v1092_v3 = vld [vmem:[%s1082_s5 + $0xf8] sm:$0xff]  ;;  %vm360_vm0 = vcmask 523264  }
  0x2e   : > { %428 = vmatprep.mubr.f32.mxu0 %v973_v0  ;;  %499 = vmatprep.mubr.f32.mxu1 %v973_v0  ;;  %v1095_v4 = vld [vmem:[%s1082_s5 + $0xe0] sm:$0xff]  ;;  %v1100_v5 = vld [vmem:[%s1082_s5 + $0xf0] sm:$0xff]  ;;  %v1103_v6 = vld [vmem:[%s1082_s5 + $0xc8] sm:$0xff]  ;;  %s767_s9 = sshll.u32 %s959_s15, 9  ;;  %s752_s10 = sshll.u32 %s1078_s29, 5 }
  0x2f   : > { %842 = vset.pattern.permute.xlu0 %v974_v1  ;;  %380 = vmatprep.subr.mxu0 %v1089_v2  ;;  %v1106_v7 = vld [vmem:[%s1082_s5 + $0xd8] sm:$0xff]  ;;  %v1111_v8 = vld [vmem:[%s1082_s5 + $0xc0] sm:$0xff]  ;;  %v1114_v9 = vld [vmem:[%s1082_s5 + $0xd0] sm:$0xff]  ;;  %s228_s11 = scalar_lea.vmem [#allocation5], %s752_s10  ;;  %s1262_s22 = scalar_lea.hbm %s1311_s3, %s767_s9 }
  0x30   : > { %451 = vmatprep.subr.mxu1 %v1092_v3  ;;  %381 = vmatpush1.msra.mxu0 %v1095_v4  ;;  %v260_v10 = vld [vmem:[%s1082_s5 + $0xa8] sm:$0xff]  ;;  %v262_v11 = vld [vmem:[%s1082_s5 + $0xb8] sm:$0xff]  ;;  %v1121_v12 = vld [vmem:[%s1082_s5 + $0xa0] sm:$0xff]  ;;  %s630_s18 = sshll.u32 %s228_s11, 4  ;;  %s614_s23 = scalar_lea.sflag [#allocation4], %s1078_s29  ;;  %s631_s18 = int_to_ptr.vmem [resolvable:$true] %s630_s18 }
  0x31   : > { %452 = vmatpush1.msra.mxu1 %v1100_v5  ;;  %382 = vmatprep.subr.mxu0 %v1103_v6  ;;  %v1124_v13 = vld [vmem:[%s1082_s5 + $0xb0] sm:$0xff]  ;;  %v256_v14 = vld [vmem:[%s1082_s5 + $0x88] sm:$0xff]  ;;  %v258_v15 = vld [vmem:[%s1082_s5 + $0x98] sm:$0xff]  ;;  %v1136_v20 = vmul.f32 %v260_v10, %v260_v10  ;;  %v1138_v21 = vmul.f32 %v262_v11, %v262_v11  ;;  %s887_s28 = scalar_lea.vmem %s631_s18, 512  ;;  %s975_s15 = smov [#allocation5]  }
  0x32   : > { %453 = vmatprep.subr.mxu1 %v1106_v7  ;;  %383 = vmatpush1.msra.mxu0 %v1111_v8  ;;  %v255_v16 = vld [vmem:[%s1082_s5 + $0x80] sm:$0xff]  ;;  %v1132_v17 = vld [vmem:[%s1082_s5 + $0x90] sm:$0xff]  ;;  %v252_v18 = vld [vmem:[%s1082_s5 + $0x68] sm:$0xff]  ;;  %v1142_v22 = vmul.f32 %v256_v14, %v256_v14  ;;  %v1147_v26 = vmul.f32 %v258_v15, %v258_v15  ;;  %p888_p8 = scmp.ne.s32.totalorder %s631_s18, %s887_s28  ;;  %s891_s30 = sshll.u32 %s975_s15, 4  ;;  %s892_s30 = int_to_ptr.vmem [resolvable:$false] %s891_s30 }
  0x33   : > { %454 = vmatpush1.msra.mxu1 %v1114_v9  ;;  %384 = vmatprep.subr.mxu0 %v260_v10  ;;  %v254_v19 = vld [vmem:[%s1082_s5 + $0x78] sm:$0xff]  ;;  %v251_v23 = vld [vmem:[%s1082_s5 + $0x60] sm:$0xff]  ;;  %v253_v24 = vld [vmem:[%s1082_s5 + $0x70] sm:$0xff]  ;;  %v284_v27 = vmul.f32 %v252_v18, %v252_v18  ;;  %v287_v58 = vmul.f32 %v255_v16, %v255_v16  ;;  %v289_v62 = vmul.f32 %v1132_v17, %v1132_v17  ;;  %s893_s4 = scalar_lea.vmem %s892_s30, 1024  ;;  %p894_p2 = scmp.lt.s32.totalorder %s631_s18, %s892_s30 }
  0x34   : > { %455 = vmatprep.subr.mxu1 %v262_v11  ;;  %385 = vmatpush1.msra.mxu0 %v1121_v12  ;;  %v248_v25 = vld [vmem:[%s1082_s5 + $0x48] sm:$0xff]  ;;  %v286_v28 = vmul.f32 %v254_v19, %v254_v19  ;;  %v250_v29 = vld [vmem:[%s1082_s5 + $0x58] sm:$0xff]  ;;  %v247_v30 = vld [vmem:[%s1082_s5 + $0x40] sm:$0xff]  ;;  %v283_v52 = vmul.f32 %v251_v23, %v251_v23  ;;  %v285_v55 = vmul.f32 %v253_v24, %v253_v24  ;;  %p889_p12 = pnand %p888_p8, %p1047_p9  ;;  %p895_p3 = scmp.lt.s32.totalorder %s893_s4, %s887_s28 }
  0x35   : > { %456 = vmatpush1.msra.mxu1 %v1124_v13  ;;  %386 = vmatprep.subr.mxu0 %v256_v14  ;;  %v249_v31 = vld [vmem:[%s1082_s5 + $0x50] sm:$0xff]  ;;  %v280_v32 = vmul.f32 %v248_v25, %v248_v25  ;;  %v282_v33 = vmul.f32 %v250_v29, %v250_v29  ;;  %v279_v34 = vmul.f32 %v247_v30, %v247_v30  ;;  %v244_v35 = vld [vmem:[%s1082_s5 + $0x28] sm:$0xff]  ;;  %v246_v36 = vld [vmem:[%s1082_s5 + $0x38] sm:$0xff] }
  0x36   : > { %457 = vmatprep.subr.mxu1 %v258_v15  ;;  %387 = vmatpush1.msra.mxu0 %v255_v16  ;;  %v243_v37 = vld [vmem:[%s1082_s5 + $0x20] sm:$0xff]  ;;  %v276_v38 = vmul.f32 %v244_v35, %v244_v35  ;;  %v278_v39 = vmul.f32 %v246_v36, %v246_v36  ;;  %v245_v41 = vld [vmem:[%s1082_s5 + $0x30] sm:$0xff]  ;;  %v240_v42 = vld [vmem:[%s1082_s5 + $0x8] sm:$0xff]  ;;  %v281_v49 = vmul.f32 %v249_v31, %v249_v31  ;;  %p890_p0 = pneg %p889_p12  ;;  %p896_p5 = por %p895_p3, %p894_p2 }
  0x37   : > { %458 = vmatpush1.msra.mxu1 %v1132_v17  ;;  %388 = vmatprep.subr.mxu0 %v252_v18  ;;  %v275_v40 = vmul.f32 %v243_v37, %v243_v37  ;;  %v242_v43 = vld [vmem:[%s1082_s5 + $0x18] sm:$0xff]  ;;  %v277_v44 = vmul.f32 %v245_v41, %v245_v41  ;;  %v272_v45 = vmul.f32 %v240_v42, %v240_v42  ;;  %v239_v47 = vld [vmem:[%s1082_s5] sm:$0xff]  ;;  %v241_v48 = vld [vmem:[%s1082_s5 + $0x10] sm:$0xff] }
  0x38   : > { %459 = vmatprep.subr.mxu1 %v254_v19  ;;  %389 = vmatpush1.msra.mxu0 %v251_v23  ;;  %v274_v46 = vmul.f32 %v242_v43, %v242_v43  ;;  %v271_v50 = vmul.f32 %v239_v47, %v239_v47  ;;  %v273_v51 = vmul.f32 %v241_v48, %v241_v48  ;;  %v359_v61 = vld [vmem:[%s1308_s0] sm:$0xff]  ;;  %p897_p6 = pnand %p896_p5, %p890_p0 }
  0x39   : > { %460 = vmatpush1.msra.mxu1 %v253_v24  ;;  %390 = vmatprep.subr.mxu0 %v248_v25  ;;  %v316_v53 = vadd.f32 %v276_v38, %v272_v45  ;;  %v593_v1 = vld [vmem:[%s1310_s2] sm:$0xff]  ;;  %v291_v10 = vmul.f32 %v1121_v12, %v1121_v12  ;;  %v293_v15 = vmul.f32 %v1124_v13, %v1124_v13 }
  0x3a   : > { %461 = vmatprep.subr.mxu1 %v250_v29  ;;  %391 = vmatpush1.msra.mxu0 %v247_v30  ;;  %v342_v54 = vadd.f32 %v278_v39, %v274_v46  ;;  %v303_v56 = vadd.f32 %v275_v40, %v271_v50  ;;  %v329_v57 = vadd.f32 %v277_v44, %v273_v51 }
  0x3b   : > { %462 = vmatpush1.msra.mxu1 %v249_v31  ;;  %392 = vmatprep.subr.mxu0 %v244_v35  ;;  %v317_v59 = vadd.f32 %v316_v53, %v280_v32  ;;  %v296_v18 = vmul.f32 %v1103_v6, %v1103_v6  ;;  %v298_v19 = vmul.f32 %v1106_v7, %v1106_v7 }
  0x3c   : > { %463 = vmatprep.subr.mxu1 %v246_v36  ;;  %393 = vmatpush1.msra.mxu0 %v243_v37  ;;  %v343_v60 = vadd.f32 %v342_v54, %v282_v33  ;;  %v304_v63 = vadd.f32 %v303_v56, %v279_v34  ;;  %v330_v0 = vadd.f32 %v329_v57, %v281_v49 }
  0x3d   : > { %464 = vmatpush1.msra.mxu1 %v245_v41  ;;  %394 = vmatprep.subr.mxu0 %v240_v42  ;;  %v318_v11 = vadd.f32 %v317_v59, %v284_v27  ;;  %v295_v13 = vmul.f32 %v1111_v8, %v1111_v8  ;;  %v297_v24 = vmul.f32 %v1114_v9, %v1114_v9 }
  0x3e   : > { %465 = vmatprep.subr.mxu1 %v242_v43  ;;  %v344_v14 = vadd.f32 %v343_v60, %v286_v28  ;;  %395 = vmatpush1.msra.mxu0 %v239_v47  ;;  %v305_v16 = vadd.f32 %v304_v63, %v283_v52  ;;  %v331_v17 = vadd.f32 %v330_v0, %v285_v55 }
  0x3f   : > { %466 = vmatpush1.msra.mxu1 %v241_v48  ;;  %753 = vmatmul.mubr.msk.f32.vlgmr.msra.gmra.mxu0 %vm360_vm0, %v359_v61  ;;  %v319_v12 = vadd.f32 %v318_v11, %v1142_v22  ;;  %v300_v28 = vmul.f32 %v1089_v2, %v1089_v2  ;;  %v302_v6 = vmul.f32 %v1092_v3, %v1092_v3 }
  0x40   : > { %754 = vmatmul.mubr.msk.f32.vlgmr.msra.gmra.mxu1 %vm360_vm0, %v359_v61  ;;  %v345_v23 = vadd.f32 %v344_v14, %v1147_v26  ;;  %595 = vperm.xlu0 %842, %v593_v1   ;;  %v306_v25 = vadd.f32 %v305_v16, %v287_v58  ;;  %v332_v27 = vadd.f32 %v331_v17, %v289_v62 }
  0x41   : > { %v320_v7 = vadd.f32 %v319_v12, %v1136_v20  ;;  %v299_v26 = vmul.f32 %v1095_v4, %v1095_v4  ;;  %v301_v8 = vmul.f32 %v1100_v5, %v1100_v5  ;;  %v582_v12 = vlaneseq }
  0x42   : > { %v346_v22 = vadd.f32 %v345_v23, %v1138_v21  ;;  %v307_v29 = vadd.f32 %v306_v25, %v291_v10  ;;  %v333_v9 = vadd.f32 %v332_v27, %v293_v15 }
  0x43   : > { %v321_v30 = vadd.f32 %v320_v7, %v296_v18 }
  0x44   : > { %v347_v31 = vadd.f32 %v346_v22, %v298_v19  ;;  %v308_v32 = vadd.f32 %v307_v29, %v295_v13  ;;  %v334_v33 = vadd.f32 %v333_v9, %v297_v24  ;;  %v588_v22 = vstv %s767_s9 }
  0x45   : > { %v322_v2 = vadd.f32 %v321_v30, %v300_v28 }
  0x46   : > { %v348_v34 = vadd.f32 %v347_v31, %v302_v6  ;;  %v309_v35 = vadd.f32 %v308_v32, %v299_v26  ;;  %v335_v3 = vadd.f32 %v334_v33, %v301_v8  ;;  %v583_v6 = vand.u32 127, %v582_v12 }
  0x47   : > { %v323_v37 = vrot.slane %v322_v2, 4 }
  0x48   : > { %v310_v36 = vrot.slane %v309_v35, 4  ;;  %v336_v20 = vrot.slane %v335_v3, 4  ;;  %v349_v21 = vrot.slane %v348_v34, 4  ;;  %v585_v7 = vadd.s32 256, %v583_v6 }
  0x49   : > { %v324_v4 = vadd.f32 %v323_v37, %v322_v2  ;;  %v584_v26 = vadd.s32 128, %v583_v6  ;;  %v586_v8 = vadd.s32 384, %v583_v6  ;;  %v1214_v29 = vadd.s32 %v588_v22, %v583_v6 }
  0x4a   : > { %v311_v38 = vadd.f32 %v310_v36, %v309_v35  ;;  %v337_v39 = vadd.f32 %v336_v20, %v335_v3  ;;  %v350_v40 = vadd.f32 %v349_v21, %v348_v34  ;;  %v1216_v9 = vadd.s32 %v588_v22, %v585_v7 }
  0x4b   : > { %v325_v42 = vrot.slane %v324_v4, 2  ;;  %v1222_v33 = vadd.s32 %v588_v22, %v584_v26  ;;  %v1224_v2 = vadd.s32 %v588_v22, %v586_v8 }
  0x4c   : > { %v312_v41 = vrot.slane %v311_v38, 2  ;;  %v338_v5 = vrot.slane %v337_v39, 2  ;;  %v351_v43 = vrot.slane %v350_v40, 2 }
  0x4d   : > { %v326_v46 = vadd.f32 %v325_v42, %v324_v4 }
  0x4e   : > { %v313_v44 = vadd.f32 %v312_v41, %v311_v38  ;;  %v339_v45 = vadd.f32 %v338_v5, %v337_v39  ;;  %v352_v47 = vadd.f32 %v351_v43, %v350_v40 }
  0x4f   : > { %v327_v50 = vrot.slane %v326_v46, 1 }
  0x50   : > { %v314_v48 = vrot.slane %v313_v44, 1  ;;  %v340_v49 = vrot.slane %v339_v45, 1  ;;  %v353_v51 = vrot.slane %v352_v47, 1 }
  0x51   : > { %v328_v54 = vadd.f32 %v327_v50, %v326_v46 }
  0x52   : > { %v315_v52 = vadd.f32 %v314_v48, %v313_v44  ;;  %v341_v53 = vadd.f32 %v340_v49, %v339_v45  ;;  %v354_v55 = vadd.f32 %v353_v51, %v352_v47 }
  0x54   : > { %843 = vrsqrt.f32 %v315_v52 }
  0x55   : > { %845 = vrsqrt.f32 %v341_v53 }
  0x56   : > { %847 = vrsqrt.f32 %v328_v54 }
  0x57   : > { %849 = vrsqrt.f32 %v354_v55 }
  0x61   : > { %v844_v56 = vpop.eup %843 }
  0x62   : > { %v846_v57 = vpop.eup %845 }
  0x63   : > { %v848_v58 = vpop.eup %847 }
  0x64   : > { %v850_v59 = vpop.eup %849 }
  0xbb   : > { %v1218_v30 = vpop.permute.xlu0 %595 }
  0xbc   : > { %vm597_vm1 = vcmp.eq.s32.totalorder %v1214_v29, %v1218_v30  ;;  %vm599_vm2 = vcmp.eq.s32.totalorder %v1216_v9, %v1218_v30  ;;  %vm598_vm7 = vcmp.eq.s32.totalorder %v1222_v33, %v1218_v30  ;;  %vm600_vm9 = vcmp.eq.s32.totalorder %v1224_v2, %v1218_v30 }
  0xff   : > { %v430_v60 = vpop.f32.mrf.mxu0 }
 0x100   : > { %v501_v61 = vpop.f32.mrf.mxu1  ;;  %v506_v62 = vmul.f32 %v844_v56, %v430_v60 }
 0x101   : > { %v508_v63 = vmul.f32 %v846_v57, %v501_v61  ;;  %v432_v0 = vpop.f32.mrf.mxu0 }
 0x102   : > { %v503_v1 = vpop.f32.mrf.mxu1  ;;  %v1195_v10 = vclamps-f32 %v506_v62, 1.0  ;;  %v507_v14 = vmul.f32 %v848_v58, %v432_v0 }
 0x103   : > { %v1197_v11 = vclamps-f32 %v508_v63, 1.0  ;;  %v509_v15 = vmul.f32 %v850_v59, %v503_v1 }
 0x104   : > { %v518_v16 = vmul.f32 %v1195_v10, %v1195_v10  ;;  %v1203_v18 = vclamps-f32 %v507_v14, 1.0  ;;  %v554_v31 = vmul.f32 0.87758255, %v1195_v10  ;;  %v759_v34 = vadd.f32 0.87758255, %v1195_v10 }
 0x105   : > { %v520_v17 = vmul.f32 %v1197_v11, %v1197_v11  ;;  %v1205_v19 = vclamps-f32 %v509_v15, 1.0  ;;  %v556_v32 = vmul.f32 0.87758255, %v1197_v11  ;;  %v761_v35 = vadd.f32 0.87758255, %v1197_v11 }
 0x106   : > { %v522_v23 = vsub.f32 1.0, %v518_v16  ;;  %v519_v24 = vmul.f32 %v1203_v18, %v1203_v18  ;;  %v763_v3 = vadd.f32 -0.23971277, %v1195_v10  ;;  %v555_v20 = vmul.f32 0.87758255, %v1203_v18 }
 0x107   : > { %v524_v13 = vsub.f32 1.0, %v520_v17  ;;  %v521_v25 = vmul.f32 %v1205_v19, %v1205_v19  ;;  %v557_v37 = vmul.f32 0.87758255, %v1205_v19  ;;  %v765_v21 = vadd.f32 -0.23971277, %v1197_v11 }
 0x108   : > { %851 = vrsqrt.f32 %v522_v23  ;;  %v523_v27 = vsub.f32 1.0, %v519_v24  ;;  %vm528_vm3 = vcmp.eq.f32.partialorder %v522_v23, inf  ;;  %vm530_vm4 = vcmp.eq.f32.partialorder %v522_v23, 0.0 }
 0x109   : > { %853 = vrsqrt.f32 %v524_v13  ;;  %v525_v28 = vsub.f32 1.0, %v521_v25  ;;  %v531_v4 = vand.u32 2147483648, %v522_v23  ;;  %vm542_vm5 = vcmp.eq.f32.partialorder %v524_v13, inf }
 0x10a   : > { %855 = vrsqrt.f32 %v523_v27  ;;  %vm544_vm6 = vcmp.eq.f32.partialorder %v524_v13, 0.0  ;;  %v545_v41 = vand.u32 2147483648, %v524_v13  ;;  %vm535_vm8 = vcmp.eq.f32.partialorder %v523_v27, inf }
 0x10b   : > { %857 = vrsqrt.f32 %v525_v28  ;;  %v760_v43 = vadd.f32 0.87758255, %v1203_v18  ;;  %v762_v44 = vadd.f32 0.87758255, %v1205_v19  ;;  %vm537_vm10 = vcmp.eq.f32.partialorder %v523_v27, 0.0 }
 0x10c   : > { %v538_v49 = vand.u32 2147483648, %v523_v27  ;;  %vm549_vm11 = vcmp.eq.f32.partialorder %v525_v28, inf  ;;  %v552_v54 = vand.u32 2147483648, %v525_v28  ;;  %vm551_vm12 = vcmp.eq.f32.partialorder %v525_v28, 0.0 }
 0x10d   : > { %vm570_vm13 = vcmp.le.f32.partialorder %v759_v34, 0.0  ;;  %vm571_vm14 = vcmp.le.f32.partialorder %v760_v43, 0.0  ;;  %vm572_vm15 = vcmp.le.f32.partialorder %v761_v35, 0.0  ;;  %v764_v1 = vadd.f32 -0.23971277, %v1203_v18 }
 0x10e   : > { %v766_v17 = vadd.f32 -0.23971277, %v1205_v19  ;;  %vm573_vm0 = vcmp.le.f32.partialorder %v762_v44, 0.0 }
 0x115   : > { %v852_v36 = vpop.eup %851 }
 0x116   : > { %v854_v38 = vpop.eup %853  ;;  %v527_v39 = vmul.f32 %v852_v36, %v522_v23 }
 0x117   : > { %v541_v40 = vmul.f32 %v854_v38, %v524_v13  ;;  %v856_v5 = vpop.eup %855 }
 0x118   : > { %v529_v42 = vsel %vm528_vm3, %v522_v23, %v527_v39  ;;  %v858_v45 = vpop.eup %857  ;;  %v534_v47 = vmul.f32 %v856_v5, %v523_v27 }
 0x119   : > { %v532_v46 = vsel %vm530_vm4, %v531_v4, %v529_v42  ;;  %v543_v48 = vsel %vm542_vm5, %v524_v13, %v541_v40  ;;  %v548_v51 = vmul.f32 %v858_v45, %v525_v28 }
 0x11a   : > { %v546_v50 = vsel %vm544_vm6, %v545_v41, %v543_v48  ;;  %v558_v52 = vmul.f32 0.47942555, %v532_v46  ;;  %v536_v53 = vsel %vm535_vm8, %v523_v27, %v534_v47 }
 0x11b   : > { %v560_v55 = vmul.f32 0.47942555, %v546_v50  ;;  %v539_v56 = vsel %vm537_vm10, %v538_v49, %v536_v53  ;;  %v550_v57 = vsel %vm549_vm11, %v525_v28, %v548_v51 }
 0x11c   : > { %v562_v58 = vsub.f32 %v554_v31, %v558_v52  ;;  %v553_v59 = vsel %vm551_vm12, %v552_v54, %v550_v57  ;;  %v559_v60 = vmul.f32 0.47942555, %v539_v56 }
 0x11d   : > { %v564_v61 = vsub.f32 %v556_v32, %v560_v55  ;;  %v561_v62 = vmul.f32 0.47942555, %v553_v59 }
 0x11e   : > { %v578_v63 = vsel %vm570_vm13, %v763_v3, %v562_v58  ;;  %v563_v0 = vsub.f32 %v555_v20, %v559_v60 }
 0x11f   : > { %v580_v14 = vsel %vm572_vm15, %v765_v21, %v564_v61  ;;  %v601_v15 = vsel %vm597_vm1, %v578_v63, %v1195_v10  ;;  %v565_v16 = vsub.f32 %v557_v37, %v561_v62 }
 0x120   : > { %v603_v12 = vsel %vm599_vm2, %v580_v14, %v1197_v11  ;;  %v605_v23 = vmul.f32 30.0, %v601_v15  ;;  %v579_v13 = vsel %vm571_vm14, %v764_v1, %v563_v0 }
 0x121   : > { %v607_v24 = vmul.f32 30.0, %v603_v12  ;;  %v581_v25 = vsel %vm573_vm0, %v766_v17, %v565_v16  ;;  %v602_v10 = vsel %vm598_vm7, %v579_v13, %v1203_v18 }
 0x122   : > { %609 = vst [vmem:[%s228_s11] sm:$0xff] %v605_v23  ;;  %v604_v11 = vsel %vm600_vm9, %v581_v25, %v1205_v19  ;;  %v606_v27 = vmul.f32 30.0, %v602_v10 }
 0x123   : > { %611 = vst [vmem:[%s228_s11 + $0x10] sm:$0xff] %v607_v24  ;;  %v608_v28 = vmul.f32 30.0, %v604_v11 }
 0x124   : > { %610 = vst [vmem:[%s228_s11 + $0x8] sm:$0xff] %v606_v27 }
 0x125   : > { %612 = vst [vmem:[%s228_s11 + $0x18] sm:$0xff] %v608_v28 }
 0x126   : > { %900 = shalt.err (!%p897_p6)
}
 0x127   : > { %s901_s5 = scalar_lea.hbm %s1262_s22, 512  ;;  %s905_s6 = scalar_lea.hbm %s1311_s3, 1024 }
 0x128   : > { %p902_p7 = scmp.ne.s32.totalorder %s1262_s22, %s901_s5  ;;  %p906_p13 = scmp.lt.s32.totalorder %s1262_s22, %s1311_s3 }
 0x129   : > { %p907_p1 = scmp.lt.s32.totalorder %s905_s6, %s901_s5 }
 0x12a   : > { %p903_p10 = pnand %p902_p7, %p1047_p9 }
 0x12b   : > { %p908_p8 = por %p907_p1, %p906_p13 }
 0x12c   : > { %p904_p4 = pneg %p903_p10 }
 0x12e   : > { %p909_p12 = pnand %p908_p8, %p904_p4 }
 0x130   : > { %912 = shalt.err (!%p909_p12)
}
 0x131   : > { %777 = dma.vmem_to_hbm [thread:$0]  (%p1047_p9), %s631_s18, 512, %s1262_s22, %s614_s23  }
 0x132 PF: > { %s642_s9 = sand.u32 1, %s947_s12   ;;  %p1317_p0 = scmp.ge.s32.totalorder %s967_s17, 2 }
 0x133   : > { %s643_s10 = scalar_lea.sflag [#allocation4], %s642_s9 }
 0x134   : > { %p784_p2 = pnand %p1317_p0, %p1054_p11 }
 0x136   : > { %p785_p3 = pneg %p784_p2 }
 0x138   : > { %942 = dma.done.wait (%p785_p3), %s643_s10, 512  }
 0x139   : > { %944 = vsyncadd (%p785_p3), %s643_s10, 4294966784  ;;  %s19_s17 = sadd.s32 1, %s967_s17   ;;  %s1318_s12 = smov %s951_s13 }
 0x13a   : > { %p16_p5 = scmp.ge.s32.totalorder %s19_s17, 4   ;;  %s1319_s13 = smov %s955_s14 }
 0x13b   : > { %s1320_s14 = smov %s1052_s26  ;;  %s1321_s15 = smov %s963_s16 }
 0x13c   : > { %s1322_s16 = smov %s1324_s20  ;;  %18 = sbr.rel (!%p16_p5) target bundleno = 6 (0x6), region = 83 }
 0x141   :  { %648 = vsyncpa [#allocation3], 1 }
 0x142   :  { %650 = vsyncpa [#allocation3 + $0x1], 1 }
 0x143   :  { %651 = vsyncpa [#allocation4], 1 }
 0x144   :  { %653 = vsyncpa [#allocation4 + $0x1], 1 }

</bundles_post_ra>
